<compile_context>
chip_gen: v5e
topology: v5e:2x2
jax: 0.10.0
libtpu: 0.0.40
codegen_flags: <defaults>
</compile_context>

<pallas_src>
import math

import numpy as np
import jax
import jax.numpy as jnp
from jax.experimental import pallas as pl
from jax.experimental.pallas import tpu as pltpu


def _round_up(x, m):
    return ((x + m - 1) // m) * m


def _time_embedding_kernel(t_ref, freq2_ref, phase2_ref,
                           w1_ref, b1_ref, w2_ref, b2_ref, o_ref):
    # t_ref:      (TB, 1)     f32 timesteps (batch tile)
    # freq2_ref:  (1, 2d)     f32: [f_0..f_{d-1}, f_0..f_{d-1}]
    # phase2_ref: (1, 2d)     f32: [0]*d + [pi/2]*d  (cos(x) == sin(x + pi/2))
    # w1_ref:     (2d, TCP)   weights (f32 or bf16), channels padded to TCP
    # b1_ref:     (1, TCP)    f32
    # w2_ref:     (TCP, TCP)  weights (f32 or bf16)
    # b2_ref:     (1, TCP)    f32
    # o_ref:      (TB, TCP)   f32
    #
    # concat([sin(e), cos(e)], axis=1) as a single fused sin over 2d lanes:
    a = jnp.sin(t_ref[...] * freq2_ref[...] + phase2_ref[...])      # (TB, 2d)
    a = a.astype(w1_ref.dtype)

    # First linear layer: one MXU matmul over the full (TB, 2d) activation.
    h = jnp.dot(a, w1_ref[...], preferred_element_type=jnp.float32) + b1_ref[...]
    # "Swish" in the source module is nn.LeakyReLU() (negative_slope=0.01).
    h = jnp.where(h > 0, h, 0.01 * h)
    h = h.astype(w2_ref.dtype)

    o_ref[...] = (jnp.dot(h, w2_ref[...], preferred_element_type=jnp.float32)
                  + b2_ref[...]).astype(o_ref.dtype)


def prepare_time_embedding_params(w1, b1, w2, b2, *,
                                  weights_dtype=jnp.float32,
                                  lane_pad=True):
    """One-time layout prep (call once per model, not per step).

    w1: [2d, TC] (PyTorch linear_1.weight.T), b1: [TC]
    w2: [TC, TC] (PyTorch linear_2.weight.T), b2: [TC]

    lane_pad=True pads channel axes to a multiple of 128 lanes (lane-dense
    unmasked stores); use lane_pad=False for small TC (e.g. 32) to avoid 4x
    zero-padded output-write / w2 bytes.  weights_dtype=jnp.bfloat16 enables
    the bf16 MXU path (accumulation stays f32); default f32 for bit-accuracy.
    """
    two_d, tc = w1.shape
    d = two_d // 2
    if d < 2:
        # factor = -log(1e5)/(d-1) would divide by zero; the PyTorch module
        # has the same restriction (time_channels must be >= 16).
        raise ValueError("time_channels must be >= 16 so that d = TC//8 >= 2")
    tcp = _round_up(tc, 128) if lane_pad else tc

    factor = -math.log(100000.0) / (d - 1)          # matches the PyTorch source
    f = np.exp(np.arange(d, dtype=np.float64) * factor).astype(np.float32)
    freq2 = jnp.asarray(np.concatenate([f, f])[None, :])                 # (1, 2d)
    phase2 = jnp.asarray(
        np.concatenate([np.zeros(d), np.full(d, np.pi / 2.0)]
                       ).astype(np.float32)[None, :])                    # (1, 2d)

    w1p = jnp.zeros((two_d, tcp), weights_dtype).at[:, :tc].set(
        w1.astype(weights_dtype))
    b1p = jnp.zeros((1, tcp), jnp.float32).at[:, :tc].set(b1.astype(jnp.float32))
    w2p = jnp.zeros((tcp, tcp), weights_dtype).at[:tc, :tc].set(
        w2.astype(weights_dtype))
    b2p = jnp.zeros((1, tcp), jnp.float32).at[:, :tc].set(b2.astype(jnp.float32))

    return dict(freq2=freq2, phase2=phase2, w1=w1p, b1=b1p, w2=w2p, b2=b2p,
                tc=tc, tcp=tcp, two_d=two_d)


def _vmem_budget_bytes(tb, two_d, tcp, w_bytes):
    """Rough double-buffered footprint, floored at the 32 MiB default scoped
    limit and capped at 48 MiB (safe under v7x's 64 MiB physical VMEM)."""
    def tile(r, c, b):  # pad to (8, 128) vreg granularity
        return _round_up(r, 8) * _round_up(c, 128) * b
    est = 2 * (tile(tb, 1, 4)                 # t
               + 2 * tile(1, two_d, 4)        # freq2 + phase2
               + tile(two_d, tcp, w_bytes)    # w1
               + tile(1, tcp, 4)              # b1
               + tile(tcp, tcp, w_bytes)      # w2
               + tile(1, tcp, 4)              # b2
               + tile(tb, tcp, 4))            # out
    est = 2 * est + (4 << 20)                 # generous headroom
    return int(min(max(est, 32 << 20), 48 << 20))


def time_embedding(t, params, *, max_batch_tile=512, slice_output=True):
    """t: [B] integer timesteps. Returns [B, time_channels] f32 (or the padded
    (B_pad, TC_pad) result when slice_output=False, for fused consumers)."""
    tc, tcp, two_d = params["tc"], params["tcp"], params["two_d"]
    B = t.shape[0]

    # v7x-aware batch tile: aim for >= 2 grid steps (one per TensorCore) while
    # staying sublane-aligned and under the VMEM-friendly cap.  Harmless on
    # v5e/v6e (single TC) and a no-op at B=2.
    tb = min(_round_up(max((B + 1) // 2, 1), 8), max_batch_tile)
    bp = _round_up(B, tb)
    nb = bp // tb

    t2 = t.astype(jnp.float32).reshape(B, 1)
    if bp != B:
        t2 = jnp.pad(t2, ((0, bp - B), (0, 0)))

    w_bytes = jnp.dtype(params["w1"].dtype).itemsize

    out = pl.pallas_call(
        _time_embedding_kernel,
        out_shape=jax.ShapeDtypeStruct((bp, tcp), jnp.float32),
        grid_spec=pltpu.PrefetchScalarGridSpec(
            num_scalar_prefetch=0,
            grid=(nb,),
            in_specs=[
                pl.BlockSpec((tb, 1), lambda i: (i, 0)),        # t (batch tile)
                pl.BlockSpec((1, two_d), lambda i: (0, 0)),     # freq table
                pl.BlockSpec((1, two_d), lambda i: (0, 0)),     # phase table
                pl.BlockSpec((two_d, tcp), lambda i: (0, 0)),   # w1 (whole)
                pl.BlockSpec((1, tcp), lambda i: (0, 0)),       # b1
                pl.BlockSpec((tcp, tcp), lambda i: (0, 0)),     # w2 (whole)
                pl.BlockSpec((1, tcp), lambda i: (0, 0)),       # b2
            ],
            out_specs=pl.BlockSpec((tb, tcp), lambda i: (i, 0)),
        ),
        compiler_params=pltpu.CompilerParams(
            dimension_semantics=("parallel",),
            vmem_limit_bytes=_vmem_budget_bytes(tb, two_d, tcp, w_bytes)),
    )(t2, params["freq2"], params["phase2"],
      params["w1"], params["b1"], params["w2"], params["b2"])

    if slice_output:
        return out[:B, :tc]
    return out   # padded (bp, tcp); fused/production consumers avoid the copy


def reference_time_embedding(t, w1, b1, w2, b2):
    """Pure-JAX reference matching the PyTorch forward (unpadded weights)."""
    two_d, tc = w1.shape
    d = two_d // 2
    factor = -math.log(100000.0) / (d - 1)
    freqs = jnp.exp(jnp.arange(d, dtype=jnp.float32) * factor)
    emb = t.astype(jnp.float32)[:, None] * freqs[None, :]
    emb = jnp.concatenate([jnp.sin(emb), jnp.cos(emb)], axis=1)
    h = emb @ w1 + b1
    h = jnp.where(h > 0, h, 0.01 * h)               # LeakyReLU(0.01)
    return h @ w2 + b2


if __name__ == "__main__":
    time_channels = 32          # TC
    d = time_channels // 8      # 4
    in1 = time_channels // 4    # 8 = 2*d
    batch = 2
    T = 1000

    key = jax.random.PRNGKey(0)
    k_t, k_w1, k_b1, k_w2, k_b2 = jax.random.split(key, 5)

    # Deterministic synthetic parameters (shapes match nn.Linear in __init__,
    # stored [in_features, out_features] i.e. PyTorch weight transposed).
    t = jax.random.randint(k_t, (batch,), 0, T, dtype=jnp.int32)
    w1 = jax.random.normal(k_w1, (in1, time_channels), jnp.float32) * (1.0 / math.sqrt(in1))
    b1 = jax.random.normal(k_b1, (time_channels,), jnp.float32) * 0.1
    w2 = jax.random.normal(k_w2, (time_channels, time_channels), jnp.float32) * (1.0 / math.sqrt(time_channels))
    b2 = jax.random.normal(k_b2, (time_channels,), jnp.float32) * 0.1

    params = prepare_time_embedding_params(w1, b1, w2, b2)   # one-time layout prep

    out = time_embedding(t, params)
    out = jax.block_until_ready(out)

    ref = reference_time_embedding(t, w1, b1, w2, b2)
    assert out.shape == (batch, time_channels)
    # Tolerance 1e-3: the cos->sin(x + pi/2) fusion adds one extra f32 rounding
    # of a large (t*f ~ 1e3) argument before the 2-layer MLP.
    assert jnp.allclose(out, ref, atol=1e-3, rtol=1e-3), "mismatch vs reference"

    print("KERNEL_OK")
</pallas_src>

<mosaic_0001>
module attributes {stable_mosaic.version = 11 : i64} {
  func.func @_time_embedding_kernel(%arg0: i32, %arg1: memref<8x1xf32, #tpu.memory_space<vmem>>, %arg2: memref<1x8xf32, #tpu.memory_space<vmem>>, %arg3: memref<1x8xf32, #tpu.memory_space<vmem>>, %arg4: memref<8x128xf32, #tpu.memory_space<vmem>>, %arg5: memref<1x128xf32, #tpu.memory_space<vmem>>, %arg6: memref<128x128xf32, #tpu.memory_space<vmem>>, %arg7: memref<1x128xf32, #tpu.memory_space<vmem>>, %arg8: memref<8x128xf32, #tpu.memory_space<vmem>>) attributes {dimension_semantics = [#tpu.dimension_semantics<parallel>], iteration_bounds = array<i64: 1>, scalar_prefetch = 0 : i64, scratch_operands = 0 : i64, tpu.core_type = #tpu.core_type<tc>, window_params = [{transform_indices = @transform_0, window_bounds = array<i64: 8, 1>}, {pipeline_mode = #tpu.pipeline_mode<synchronous>, transform_indices = @transform_1, window_bounds = array<i64: 1, 8>}, {pipeline_mode = #tpu.pipeline_mode<synchronous>, transform_indices = @transform_2, window_bounds = array<i64: 1, 8>}, {pipeline_mode = #tpu.pipeline_mode<synchronous>, transform_indices = @transform_3, window_bounds = array<i64: 8, 128>}, {pipeline_mode = #tpu.pipeline_mode<synchronous>, transform_indices = @transform_4, window_bounds = array<i64: 1, 128>}, {pipeline_mode = #tpu.pipeline_mode<synchronous>, transform_indices = @transform_5, window_bounds = array<i64: 128, 128>}, {pipeline_mode = #tpu.pipeline_mode<synchronous>, transform_indices = @transform_6, window_bounds = array<i64: 1, 128>}, {transform_indices = @transform_7, window_bounds = array<i64: 8, 128>}]} {
    %c0 = arith.constant 0 : index
    %c0_0 = arith.constant 0 : index
    %0 = vector.load %arg1[%c0, %c0_0] : memref<8x1xf32, #tpu.memory_space<vmem>>, vector<8x1xf32>
    %c0_1 = arith.constant 0 : index
    %c0_2 = arith.constant 0 : index
    %1 = vector.load %arg2[%c0_1, %c0_2] : memref<1x8xf32, #tpu.memory_space<vmem>>, vector<1x8xf32>
    %2 = vector.broadcast %0 : vector<8x1xf32> to vector<8x8xf32>
    %3 = vector.broadcast %1 : vector<1x8xf32> to vector<8x8xf32>
    %4 = arith.mulf %2, %3 : vector<8x8xf32>
    %c0_3 = arith.constant 0 : index
    %c0_4 = arith.constant 0 : index
    %5 = vector.load %arg3[%c0_3, %c0_4] : memref<1x8xf32, #tpu.memory_space<vmem>>, vector<1x8xf32>
    %6 = vector.broadcast %5 : vector<1x8xf32> to vector<8x8xf32>
    %7 = arith.addf %4, %6 : vector<8x8xf32>
    %8 = math.sin %7 : vector<8x8xf32>
    %c0_5 = arith.constant 0 : index
    %c0_6 = arith.constant 0 : index
    %9 = vector.load %arg4[%c0_5, %c0_6] : memref<8x128xf32, #tpu.memory_space<vmem>>, vector<8x128xf32>
    %cst = arith.constant dense<0.000000e+00> : vector<8x128xf32>
    %10 = tpu.matmul %8, %9, %cst {dimension_numbers = #tpu.dot_dimension_numbers<[1], [0], [0], [1], [0, 0, 1, 1], [], []>} : vector<8x8xf32>, vector<8x128xf32>, vector<8x128xf32> -> vector<8x128xf32>
    %c0_7 = arith.constant 0 : index
    %c0_8 = arith.constant 0 : index
    %11 = vector.load %arg5[%c0_7, %c0_8] : memref<1x128xf32, #tpu.memory_space<vmem>>, vector<1x128xf32>
    %12 = vector.broadcast %11 : vector<1x128xf32> to vector<8x128xf32>
    %13 = arith.addf %10, %12 : vector<8x128xf32>
    %cst_9 = arith.constant 0.000000e+00 : f32
    %14 = vector.broadcast %cst_9 : f32 to vector<8x128xf32>
    %15 = arith.cmpf ogt, %13, %14 : vector<8x128xf32>
    %cst_10 = arith.constant 0.00999999977 : f32
    %16 = vector.broadcast %cst_10 : f32 to vector<8x128xf32>
    %17 = arith.mulf %16, %13 : vector<8x128xf32>
    %18 = arith.select %15, %13, %17 : vector<8x128xi1>, vector<8x128xf32>
    %c0_11 = arith.constant 0 : index
    %c0_12 = arith.constant 0 : index
    %19 = vector.load %arg6[%c0_11, %c0_12] : memref<128x128xf32, #tpu.memory_space<vmem>>, vector<128x128xf32>
    %cst_13 = arith.constant dense<0.000000e+00> : vector<8x128xf32>
    %20 = tpu.matmul %18, %19, %cst_13 {dimension_numbers = #tpu.dot_dimension_numbers<[1], [0], [0], [1], [0, 0, 1, 1], [], []>} : vector<8x128xf32>, vector<128x128xf32>, vector<8x128xf32> -> vector<8x128xf32>
    %c0_14 = arith.constant 0 : index
    %c0_15 = arith.constant 0 : index
    %21 = vector.load %arg7[%c0_14, %c0_15] : memref<1x128xf32, #tpu.memory_space<vmem>>, vector<1x128xf32>
    %22 = vector.broadcast %21 : vector<1x128xf32> to vector<8x128xf32>
    %23 = arith.addf %20, %22 : vector<8x128xf32>
    %c0_16 = arith.constant 0 : index
    %c0_17 = arith.constant 0 : index
    %24 = vector.load %arg8[%c0_16, %c0_17] : memref<8x128xf32, #tpu.memory_space<vmem>>, vector<8x128xf32>
    tpu.vector_store %arg8[%c0_16, %c0_17], %23 {strides = array<i32>} : memref<8x128xf32, #tpu.memory_space<vmem>>, vector<8x128xf32>,
    return
  }
  func.func @transform_0(%arg0: i32) -> (i32, i32) {
    %c0_i32 = arith.constant 0 : i32
    %c0_i32_0 = arith.constant 0 : i32
    return %arg0, %c0_i32 : i32, i32
  }
  func.func @transform_1(%arg0: i32) -> (i32, i32) {
    %c0_i32 = arith.constant 0 : i32
    %c0_i32_0 = arith.constant 0 : i32
    %c0_i32_1 = arith.constant 0 : i32
    return %c0_i32, %c0_i32_0 : i32, i32
  }
  func.func @transform_2(%arg0: i32) -> (i32, i32) {
    %c0_i32 = arith.constant 0 : i32
    %c0_i32_0 = arith.constant 0 : i32
    %c0_i32_1 = arith.constant 0 : i32
    return %c0_i32, %c0_i32_0 : i32, i32
  }
  func.func @transform_3(%arg0: i32) -> (i32, i32) {
    %c0_i32 = arith.constant 0 : i32
    %c0_i32_0 = arith.constant 0 : i32
    %c0_i32_1 = arith.constant 0 : i32
    return %c0_i32, %c0_i32_0 : i32, i32
  }
  func.func @transform_4(%arg0: i32) -> (i32, i32) {
    %c0_i32 = arith.constant 0 : i32
    %c0_i32_0 = arith.constant 0 : i32
    %c0_i32_1 = arith.constant 0 : i32
    return %c0_i32, %c0_i32_0 : i32, i32
  }
  func.func @transform_5(%arg0: i32) -> (i32, i32) {
    %c0_i32 = arith.constant 0 : i32
    %c0_i32_0 = arith.constant 0 : i32
    %c0_i32_1 = arith.constant 0 : i32
    return %c0_i32, %c0_i32_0 : i32, i32
  }
  func.func @transform_6(%arg0: i32) -> (i32, i32) {
    %c0_i32 = arith.constant 0 : i32
    %c0_i32_0 = arith.constant 0 : i32
    %c0_i32_1 = arith.constant 0 : i32
    return %c0_i32, %c0_i32_0 : i32, i32
  }
  func.func @transform_7(%arg0: i32) -> (i32, i32) {
    %c0_i32 = arith.constant 0 : i32
    %c0_i32_0 = arith.constant 0 : i32
    return %arg0, %c0_i32 : i32, i32
  }
}

</mosaic_0001>

<bundles_post_ra>
// kernel: tpu_custom_call.1
= control target key start
LH: loop header
LB: loop body
LE: loop exit
PB: predicated region body
PF: predicated region fallthrough
CT: control target
= control target key end

     0   :  { %12 = vsyncpa [#allocation3], 0  ;;  %s518_s0 = inlined_call_operand.vmem [shape: f32[8,1], index: 0, kind: input, shape index: {}]   ;;  %s519_s1 = inlined_call_operand.vmem [shape: f32[1,8], index: 1, kind: input, shape index: {}]   ;;  %s520_s2 = inlined_call_operand.vmem [shape: f32[1,8], index: 2, kind: input, shape index: {}]   ;;  %s521_s3 = inlined_call_operand.vmem [shape: f32[8,128], index: 3, kind: input, shape index: {}]   ;;  %s522_s4 = inlined_call_operand.vmem [shape: f32[1,128], index: 4, kind: input, shape index: {}]   ;;  %s523_s5 = inlined_call_operand.hbm [shape: f32[128,128], index: 5, kind: input, shape index: {}]   ;;  %s524_s6 = inlined_call_operand.vmem [shape: f32[1,128], index: 6, kind: input, shape index: {}]   ;;  %s525_s7 = inlined_call_operand.hbm [shape: f32[8,128], index: 7, kind: output, shape index: {}]  }
   0x1   :  { %13 = vsyncpa [#allocation4], 0  ;;  %s28_s26 = sshll.u32 %s523_s5, 4  ;;  %s376_s27 = smov [#allocation2]   ;;  %s29_s26 = int_to_ptr.hbm [resolvable:$true] %s28_s26 }
   0x2   :  { %s30_s28 = sshll.u32 %s376_s27, 4  ;;  %s377_s29 = smov 128   ;;  %s31_s28 = int_to_ptr.vmem [resolvable:$true] %s30_s28 }
   0x3   :  { %s378_s30 = smov 8  }
   0x4   :  { %36 = dma.hbm_to_vmem [thread:$0]  %s29_s26, 2048, %s31_s28, [#allocation3], %s377_s29, %s377_s29, %s378_s30  }
   0x5   :  { %372 = dma.done.wait [#allocation3], 2048  }
   0x6   :  { %373 = vsyncadd [#allocation3], 4294965248  ;;  %v379_v0 = vmov 0   ;;  %v43_v1 = vld [vmem:[%s518_s0] sm:$0xff]  ;;  %v380_v19 = vmov 2102212464  }
   0x7   :  { %319 = vset.pattern.permute.xlu0 %v379_v0  ;;  %v214_v2 = vld [vmem:[%s521_s3] sm:$0xff]  ;;  %v381_v21 = vmov 920167782   ;;  %v382_v24 = vmov 1326507024   ;;  %s386_s15 = smov [#allocation5]  }
   0x8   :  { %47 = vperm.xlu0 %319, %v43_v1   ;;  %238 = vmatpush.msra.mxu0 %v214_v2  ;;  %v320_v3 = vld [vmem:[%s519_s1] ss:$0 sm:$0xff]  ;;  %v383_v26 = vmov 683565275   ;;  %v384_v28 = vmov 2475754826  }
   0x9   :  { %v321_v4 = vld [vmem:[%s520_s2] ss:$0 sm:$0xff]  ;;  %v385_v31 = vmov 2131351028   ;;  %s292_s16 = sshll.u32 %s386_s15, 4  ;;  %s294_s19 = sshll.u32 %s525_s7, 4  ;;  %s293_s16 = int_to_ptr.vmem [resolvable:$true] %s292_s16  ;;  %s295_s19 = int_to_ptr.hbm [resolvable:$true] %s294_s19 }
  0x7a   :  { %v48_v5 = vpop.permute.xlu0 %47 }
  0x7b   :  { %v53_v6 = vmul.f32 %v320_v3, %v48_v5 }
  0x7d   :  { %v443_v7 = vadd.f32 %v321_v4, %v53_v6 }
  0x7f   :  { %v62_v8 = vand.u32 2139095040, %v443_v7  ;;  %v59_v11 = vand.u32 2147483647, %v443_v7  ;;  %vm61_vm12 = vcmp.lt.s32.totalorder %v443_v7, 0 }
  0x81   :  { %v63_v9 = vshrl.u32 %v62_v8, 23  ;;  %v66_v13 = vand.u32 8388607, %v59_v11  ;;  %vm499_vm13 = vcmp.le.f32.partialorder %v59_v11, 0.7853982 }
  0x83   :  { %v304_v10 = vadd.s32 4294967169, %v63_v9  ;;  %v67_v17 = vor.u32 8388608, %v66_v13 }
  0x85   :  { %v69_v12 = vadd.s32 1, %v304_v10  ;;  %v458_v38 = vshll.u32 %v67_v17, 8 }
  0x87   :  { %vm70_vm0 = vcmp.gt.s32.totalorder %v69_v12, 0  ;;  %v108_v48 = vand.u32 65535, %v458_v38  ;;  %v109_v50 = vshrl.u32 %v458_v38, 16 }
  0x88   :  { %v71_v14 = vsel %vm70_vm0, %v69_v12, 0 }
  0x89   :  { %v73_v15 = vand.u32 31, %v71_v14  ;;  %v451_v18 = vshrl.u32 %v71_v14, 5 }
  0x8b   :  { %v449_v16 = vsub.s32 32, %v73_v15  ;;  %v85_v20 = vshll.u32 %v380_v19, %v73_v15  ;;  %v88_v22 = vshll.u32 %v381_v21, %v73_v15  ;;  %v76_v27 = vshll.u32 %v383_v26, %v73_v15 }
  0x8c   :  { %v79_v30 = vshll.u32 %v384_v28, %v73_v15  ;;  %v82_v33 = vshll.u32 %v385_v31, %v73_v15  ;;  %vm94_vm1 = vcmp.lt.s32.totalorder %v451_v18, 4  ;;  %vm91_vm2 = vcmp.lt.s32.totalorder %v451_v18, 1 }
  0x8d   :  { %v86_v23 = vshrl.u32 %v381_v21, %v449_v16  ;;  %v89_v25 = vshrl.u32 %v382_v24, %v449_v16  ;;  %v77_v29 = vshrl.u32 %v384_v28, %v449_v16  ;;  %v80_v32 = vshrl.u32 %v385_v31, %v449_v16 }
  0x8e   :  { %v83_v34 = vshrl.u32 %v380_v19, %v449_v16  ;;  %vm93_vm3 = vcmp.lt.s32.totalorder %v451_v18, 3  ;;  %vm92_vm4 = vcmp.lt.s32.totalorder %v451_v18, 2  ;;  %v75_v12 = vshrl.u32 %v383_v26, %v449_v16 }
  0x8f   :  { %v87_v35 = vor.u32 %v86_v23, %v85_v20  ;;  %v90_v36 = vor.u32 %v89_v25, %v88_v22  ;;  %v78_v37 = vor.u32 %v77_v29, %v76_v27  ;;  %v81_v39 = vor.u32 %v80_v32, %v79_v30 }
  0x90   :  { %v84_v40 = vor.u32 %v83_v34, %v82_v33 }
  0x91   :  { %v100_v41 = vsel %vm94_vm1, %v87_v35, 920167782  ;;  %v104_v42 = vsel %vm94_vm1, %v90_v36, 1326507024  ;;  %v99_v43 = vsel %vm91_vm2, %v78_v37, %v81_v39  ;;  %v95_v20 = vsel %vm91_vm2, %v75_v12, %v78_v37  ;;  %v252_v12 = vld [vmem:[#allocation2 + $0x30] sm:$0xff] }
  0x92   :  { %v101_v44 = vsel %vm93_vm3, %v84_v40, %v100_v41  ;;  %v103_v45 = vsel %vm91_vm2, %v81_v39, %v84_v40  ;;  %v105_v47 = vsel %vm93_vm3, %v87_v35, %v104_v42  ;;  %v96_v8 = vsel %vm94_vm1, %v84_v40, 2102212464 }
  0x93   :  { %v102_v46 = vsel %vm92_vm4, %v99_v43, %v101_v44  ;;  %v106_v49 = vsel %vm92_vm4, %v103_v45, %v105_v47  ;;  %v97_v21 = vsel %vm93_vm3, %v81_v39, %v96_v8  ;;  %vm219_vm1 = vcmask 64512  }
  0x94   :  { %v132_v51 = vand.u32 65535, %v102_v46  ;;  %v133_v52 = vshrl.u32 %v102_v46, 16  ;;  %v110_v53 = vand.u32 65535, %v106_v49  ;;  %v111_v54 = vshrl.u32 %v106_v49, 16 }
  0x95   :  { %v98_v26 = vsel %vm92_vm4, %v95_v20, %v97_v21  ;;  %vm202_vm2 = vweird.f32 %v443_v7 }
  0x96   :  { %v135_v55 = vmul.u32 %v133_v52, %v108_v48  ;;  %v136_v56 = vmul.u32 %v132_v51, %v109_v50  ;;  %v113_v57 = vmul.u32 %v111_v54, %v108_v48  ;;  %v114_v58 = vmul.u32 %v110_v53, %v109_v50 }
  0x97   :  { %v134_v59 = vmul.u32 %v132_v51, %v108_v48  ;;  %v112_v61 = vmul.u32 %v110_v53, %v108_v48  ;;  %v137_v63 = vmul.u32 %v133_v52, %v109_v50  ;;  %v115_v1 = vmul.u32 %v111_v54, %v109_v50  ;;  %v261_v50 = vld [vmem:[#allocation2 + $0x78] sm:$0xff]  ;;  %v260_v51 = vld [vmem:[#allocation2 + $0x70] sm:$0xff]  ;;  %v259_v53 = vld [vmem:[#allocation2 + $0x68] sm:$0xff] }
  0x98   :  { %v138_v60 = vshll.u32 %v135_v55, 16  ;;  %v116_v62 = vshll.u32 %v113_v57, 16  ;;  %v140_v2 = vshll.u32 %v136_v56, 16  ;;  %v118_v4 = vshll.u32 %v114_v58, 16  ;;  %266 = vmatpush.msra.mxu1 %v261_v50 }
  0x99   :  { %v139_v17 = vshrl.u32 %v135_v55, 16  ;;  %v117_v22 = vshrl.u32 %v113_v57, 16  ;;  %v141_v24 = vshrl.u32 %v136_v56, 16  ;;  %v119_v27 = vshrl.u32 %v114_v58, 16  ;;  %v258_v56 = vld [vmem:[#allocation2 + $0x60] sm:$0xff]  ;;  %v257_v58 = vld [vmem:[#allocation2 + $0x58] sm:$0xff] }
  0x9a   :  { %vm142_vm5 = vc.u32 %v134_v59, %v138_v60  ;;  %v144_v3 = vadd.s32 %v138_v60, %v134_v59  ;;  %vm120_vm6 = vc.u32 %v112_v61, %v116_v62  ;;  %v122_v5 = vadd.s32 %v116_v62, %v112_v61  ;;  %267 = vmatpush.msra.mxu1 %v260_v51  ;;  %v256_v60 = vld [vmem:[#allocation2 + $0x50] sm:$0xff] }
  0x9b   :  { %v143_v6 = vsel %vm142_vm5, 1, %v379_v0  ;;  %v121_v9 = vsel %vm120_vm6, 1, %v379_v0  ;;  %v152_v31 = vmul.u32 %v458_v38, %v98_v26 }
  0x9c   :  { %v145_v10 = vadd.s32 %v143_v6, %v137_v63  ;;  %vm146_vm7 = vc.u32 %v144_v3, %v140_v2  ;;  %v123_v13 = vadd.s32 %v121_v9, %v115_v1  ;;  %vm124_vm8 = vc.u32 %v122_v5, %v118_v4  ;;  %268 = vmatpush.msra.mxu1 %v259_v53  ;;  %v254_v4 = vld [vmem:[#allocation2 + $0x40] sm:$0xff]  ;;  %v253_v9 = vld [vmem:[#allocation2 + $0x38] sm:$0xff] }
  0x9d   :  { %v147_v14 = vsel %vm146_vm7, 1, %v379_v0  ;;  %v125_v15 = vsel %vm124_vm8, 1, %v379_v0  ;;  %v148_v0 = vadd.s32 %v144_v3, %v140_v2  ;;  %v255_v2 = vld [vmem:[#allocation2 + $0x48] sm:$0xff] }
  0x9e   :  { %v149_v19 = vadd.s32 %v147_v14, %v145_v10  ;;  %v127_v23 = vadd.s32 %v125_v15, %v123_v13  ;;  %269 = vmatpush.msra.mxu1 %v258_v56 }
  0xa0   :  { %v150_v25 = vadd.s32 %v149_v19, %v139_v17  ;;  %v128_v16 = vadd.s32 %v127_v23, %v117_v22  ;;  %270 = vmatpush.msra.mxu1 %v257_v58  ;;  %v251_v17 = vld [vmem:[#allocation2 + $0x28] sm:$0xff]  ;;  %v250_v22 = vld [vmem:[#allocation2 + $0x20] sm:$0xff] }
  0xa2   :  { %v151_v28 = vadd.s32 %v150_v25, %v141_v24  ;;  %v129_v29 = vadd.s32 %v128_v16, %v119_v27  ;;  %271 = vmatpush.msra.mxu1 %v256_v60  ;;  %v249_v25 = vld [vmem:[#allocation2 + $0x18] sm:$0xff] }
  0xa4   :  { %v155_v30 = vadd.s32 1, %v151_v28  ;;  %vm154_vm9 = vc.u32 %v129_v29, %v148_v0  ;;  %v153_v43 = vadd.s32 %v148_v0, %v129_v29  ;;  %272 = vmatpush.msra.mxu1 %v255_v2 }
  0xa6   :  { %v156_v32 = vsel %vm154_vm9, %v155_v30, %v151_v28  ;;  %273 = vmatpush.msra.mxu1 %v254_v4 }
  0xa7   :  { %v157_v33 = vadd.s32 %v156_v32, %v152_v31 }
  0xa8   :  { %274 = vmatpush.msra.mxu1 %v253_v9 }
  0xa9   :  { %v158_v34 = vadd.s32 536870912, %v157_v33 }
  0xaa   :  { %275 = vmatpush.msra.mxu1 %v252_v12 }
  0xab   :  { %v159_v35 = vshrl.u32 %v158_v34, 30  ;;  %v248_v34 = vld [vmem:[#allocation2 + $0x10] sm:$0xff] }
  0xac   :  { %276 = vmatpush.msra.mxu1 %v251_v17 }
  0xad   :  { %v160_v36 = vshll.u32 %v159_v35, 30  ;;  %v183_v63 = vsub.s32 4, %v159_v35 }
  0xae   :  { %277 = vmatpush.msra.mxu1 %v250_v22 }
  0xaf   :  { %v161_v37 = vsub.s32 %v157_v33, %v160_v36  ;;  %v184_v8 = vsel %vm61_vm12, %v183_v63, %v159_v35  ;;  %v247_v35 = vld [vmem:[#allocation2 + $0x8] sm:$0xff]  ;;  %v246_v36 = vld [vmem:[#allocation2] sm:$0xff] }
  0xb0   :  { %v186_v13 = vsel %vm499_vm13, 0, %v184_v8  ;;  %278 = vmatpush.msra.mxu1 %v249_v25 }
  0xb1   :  { %vm162_vm10 = vcmp.lt.s32.totalorder %v161_v37, 0  ;;  %v163_v39 = vsub.s32 0, %v161_v37  ;;  %v203_v21 = vadd.s32 3, %v186_v13 }
  0xb2   :  { %279 = vmatpush.msra.mxu1 %v248_v34 }
  0xb3   :  { %v164_v40 = vsel %vm162_vm10, %v163_v39, %v161_v37  ;;  %v204_v26 = vand.u32 3, %v203_v21 }
  0xb4   :  { %v165_v41 = vclz %v164_v40  ;;  %280 = vmatpush.msra.mxu1 %v247_v35 }
  0xb5   :  { %vm206_vm14 = vcmp.eq.s32.totalorder %v204_v26, 0  ;;  %vm209_vm15 = vcmp.eq.s32.totalorder %v204_v26, 2  ;;  %vm205_vm0 = vcmp.lt.s32.totalorder %v204_v26, 2 }
  0xb6   :  { %v305_v42 = vadd.s32 4294967294, %v165_v41  ;;  %281 = vmatpush.msra.mxu1 %v246_v36 }
  0xb8   :  { %vm306_vm11 = vcmp.lt.s32.totalorder %v305_v42, 0 }
  0xb9   :  { %v168_v18 = vsel %vm306_vm11, 0, %v305_v42 }
  0xba   :  { %v169_v44 = vsub.s32 32, %v168_v18  ;;  %v173_v45 = vsub.s32 4294967266, %v168_v18  ;;  %v170_v46 = vshll.u32 %v161_v37, %v168_v18  ;;  %v322_v37 = vld [vmem:[%s522_s4] ss:$0 sm:$0xff] }
  0xbc   :  { %v171_v47 = vshrl.u32 %v153_v43, %v169_v44  ;;  %v174_v38 = vadd.s32 127, %v173_v45 }
  0xbe   :  { %v172_v48 = vor.u32 %v171_v47, %v170_v46  ;;  %v175_v49 = vshll.u32 %v174_v38, 23 }
  0xc0   :  { %v176_v52 = vor.u32 4788187, %v175_v49  ;;  %v179_v55 = vcvt.s32.f32 %v172_v48 }
  0xc2   :  { %v177_v54 = vand.u32 2147483647, %v176_v52 }
  0xc4   :  { %v180_v57 = vmul.f32 %v179_v55, %v177_v54 }
  0xc6   :  { %v181_v59 = vxor.u32 2147483648, %v180_v57 }
  0xc8   :  { %v182_v62 = vsel %vm61_vm12, %v181_v59, %v180_v57 }
  0xc9   :  { %v185_v1 = vsel %vm499_vm13, %v443_v7, %v182_v62  ;;  %v323_v7 = vld [vmem:[%s524_s6] ss:$0 sm:$0xff] }
  0xca   :  { %v187_v3 = vmul.f32 %v185_v1, %v185_v1 }
  0xcc   :  { %v188_v5 = vmul.f32 -0.001358992, %v187_v3  ;;  %v195_v6 = vmul.f32 -0.00019511016, %v187_v3 }
  0xce   :  { %v189_v11 = vadd.f32 0.041655596, %v188_v5  ;;  %v196_v10 = vadd.f32 0.008332121, %v195_v6 }
  0xd0   :  { %v190_v14 = vmul.f32 %v189_v11, %v187_v3  ;;  %v197_v15 = vmul.f32 %v196_v10, %v187_v3 }
  0xd2   :  { %v191_v19 = vadd.f32 -0.4999988, %v190_v14  ;;  %v198_v20 = vadd.f32 -0.16666654, %v197_v15 }
  0xd4   :  { %v192_v23 = vmul.f32 %v191_v19, %v187_v3  ;;  %v199_v24 = vmul.f32 %v198_v20, %v187_v3 }
  0xd6   :  { %v193_v27 = vadd.f32 1.0, %v192_v23  ;;  %v200_v16 = vadd.f32 1.0, %v199_v24 }
  0xd8   :  { %v201_v28 = vmul.f32 %v200_v16, %v185_v1  ;;  %v210_v29 = vxor.u32 2147483648, %v193_v27 }
  0xda   :  { %v207_v0 = vxor.u32 2147483648, %v201_v28  ;;  %v211_v31 = vsel %vm209_vm15, %v210_v29, %v201_v28 }
  0xdc   :  { %v208_v30 = vsel %vm206_vm14, %v193_v27, %v207_v0 }
  0xdd   :  { %v212_v32 = vsel %vm205_vm0, %v208_v30, %v211_v31 }
  0xde   :  { %v213_v33 = vsel %vm202_vm2, nan, %v212_v32 }
  0xdf   :  { %307 = vmatmul.msk.f32.vlgmr.msra.gmra.mxu0 %vm219_vm1, %v213_v33 }
 0x15c   :  { %v240_v39 = vpop.f32.mrf.mxu0 }
 0x15d   :  { %v241_v40 = vadd.f32 %v322_v37, %v240_v39 }
 0x15f   :  { %vm243_vm3 = vcmp.gt.f32.partialorder %v241_v40, 0.0  ;;  %v244_v41 = vmul.f32 0.01, %v241_v40 }
 0x161   :  { %v245_v42 = vsel %vm243_vm3, %v241_v40, %v244_v41 }
 0x162   :  { %282 = vmatmul.f32.vlgmr.msra.gmra.mxu1 %v245_v42 }
 0x1df   :  { %v283_v18 = vpop.f32.mrf.mxu1 }
 0x1e0   :  { %v284_v43 = vadd.f32 %v323_v7, %v283_v18 }
 0x1e2   :  { %286 = vst [vmem:[#allocation5] sm:$0xff] %v284_v43 }
 0x1e3   :  { %297 = dma.vmem_to_hbm [thread:$0]  %s293_s16, 128, %s295_s19, [#allocation4]  }
 0x1e4   :  { %374 = dma.done.wait [#allocation4], 128  }
 0x1e5   :  { %375 = vsyncadd [#allocation4], 4294967168 }
 0x1e6   :  { %302 = vsyncpa [#allocation3], 1 }
 0x1e7   :  { %303 = vsyncpa [#allocation4], 1 }

</bundles_post_ra>
